<compile_context>
chip_gen: v5e
topology: v5e:2x2
jax: 0.10.0
libtpu: 0.0.40
codegen_flags: <defaults>
</compile_context>

<pallas_src>
import jax
import jax.numpy as jnp
from jax import lax
from jax.experimental import pallas as pl
from jax.experimental.pallas import tpu as pltpu


def _pooler_kernel(x_ref, w_ref, b_ref, o_ref):
    # x_ref: [B, H]   first-token hidden states (grid-invariant, stays resident)
    # w_ref: [TN, H]  tile of weight rows, native PyTorch [out, in] layout
    # b_ref: [1, TN]  bias tile
    # o_ref: [B, TN]  output tile (TN is a multiple of 128 or == H -> lane-dense)
    y = lax.dot_general(
        x_ref[...], w_ref[...],
        dimension_numbers=(((1,), (1,)), ((), ())),   # contract H with "in" => x @ W.T
        preferred_element_type=jnp.float32,
    )
    # Bias add (VPU) + tanh (EUP) occupy slots that idle while the next weight
    # tile DMAs in -> free filler; keep them in-kernel.
    y = y + b_ref[...].astype(jnp.float32)
    o_ref[...] = jnp.tanh(y).astype(o_ref.dtype)


def _device_is_v7x() -> bool:
    try:
        kind = jax.devices()[0].device_kind.lower()
    except Exception:
        return False
    return ("v7" in kind) or ("7x" in kind)


def _vmem_capacity_bytes(is_v7x: bool) -> int:
    try:
        return int(pltpu.get_tpu_info().vmem_capacity_bytes)
    except Exception:
        # v7x: 64 MiB per TC; v5e/v6e: 128 MiB.
        return (64 if is_v7x else 128) * 1024 * 1024


def _largest_divisor_leq(m: int, bound: int) -> int:
    bound = max(1, min(m, bound))
    for d in range(bound, 0, -1):
        if m % d == 0:
            return d
    return 1


def _plan(B: int, H: int, x_itemsize: int, w_itemsize: int, o_itemsize: int):
    """Pick the output-axis tile TN and an explicit scoped-VMEM limit.

    TN is always a multiple of 128 that divides H (or TN == H when H is not
    128-aligned), so every block is full: lane-dense stores, no edge masking.
    """
    is_v7x = _device_is_v7x()
    vmem_cap = _vmem_capacity_bytes(is_v7x)
    cap = int(0.70 * vmem_cap)            # headroom for Mosaic internals

    def vmem_usage(tn):
        return (2 * tn * H * w_itemsize     # weight tile, double-buffered
                + 2 * B * H * x_itemsize    # resident activations (2 buffers)
                + 2 * B * tn * o_itemsize   # output tile, double-buffered
                + 2 * tn * 4)               # bias tiles

    if H % 128 != 0:
        tn = H                              # full-array block satisfies layout rule
    else:
        m = H // 128
        # v7x HBM (~3.2 TB/s) drains a 4 MiB tile in ~1.3 us against ~0.35 us
        # per-step overhead -> use much bigger tiles there. 4 MiB is plenty on
        # v5e/v6e where the same tile takes ~3-5 us.
        per_buffer_budget = (12 if is_v7x else 4) * 1024 * 1024
        d = _largest_divisor_leq(m, per_buffer_budget // (128 * H * w_itemsize))
        # Keep >= 2 steps per TensorCore: 4 tiles on v7x (2 TCs under
        # "parallel" megacore sharding), 2 tiles elsewhere, so each core's
        # weight DMA double-buffers against its MXU work.
        min_tiles = 4 if is_v7x else 2
        if m >= min_tiles and m // d < min_tiles:
            d = _largest_divisor_leq(m, m // min_tiles)
        # Shrink further if the total footprint would exceed the VMEM cap
        # (matters on v5e at large B where the resident activations are big).
        while d > 1 and vmem_usage(128 * d) + (2 << 20) > cap:
            d = _largest_divisor_leq(m, d - 1)
        tn = 128 * d

    vmem_limit = int(min(cap, max(32 << 20, vmem_usage(tn) + (4 << 20))))
    return tn, vmem_limit


def text_pooler(hidden_states, weight, bias):
    """TextPooler forward: tanh(hidden_states[:, 0] @ weight.T + bias).

    hidden_states: [B, S, H]
    weight:        [H, H]  (PyTorch nn.Linear layout: [out, in])
    bias:          [H]
    returns:       [B, H]
    """
    B, S, H = hidden_states.shape
    assert weight.shape == (H, H)
    assert bias.shape == (H,)

    # The first-token gather stays as a wrapper slice, but allow_input_fusion
    # on operand 0 lets XLA fuse it into the pallas_call operand read, so it
    # no longer costs a separate dispatch nor a B*H HBM write+read.
    first_token = hidden_states[:, 0, :]            # [B, H]
    bias2d = bias.reshape(1, H)                     # [1, H]

    w_item = jnp.dtype(weight.dtype).itemsize
    x_item = jnp.dtype(hidden_states.dtype).itemsize
    o_item = x_item
    tn, vmem_limit = _plan(B, H, x_item, w_item, o_item)
    grid_n = H // tn

    cost = pl.CostEstimate(
        flops=2 * B * H * H,
        transcendentals=B * H,
        bytes_accessed=(H * H + H) * w_item + 2 * B * H * x_item,
    )

    return pl.pallas_call(
        _pooler_kernel,
        out_shape=jax.ShapeDtypeStruct((B, H), hidden_states.dtype),
        grid_spec=pltpu.PrefetchScalarGridSpec(
            num_scalar_prefetch=0,
            grid=(grid_n,),
            in_specs=[
                pl.BlockSpec((B, H), lambda j: (0, 0)),    # activations (resident)
                pl.BlockSpec((tn, H), lambda j: (j, 0)),   # weight rows, native layout
                pl.BlockSpec((1, tn), lambda j: (0, j)),   # bias tile
            ],
            out_specs=pl.BlockSpec((B, tn), lambda j: (0, j)),
        ),
        compiler_params=pltpu.CompilerParams(
            dimension_semantics=("parallel",),
            vmem_limit_bytes=vmem_limit,
            allow_input_fusion=[True, False, False],
        ),
        cost_estimate=cost,
    )(first_token, weight, bias2d)


if __name__ == "__main__":
    key = jax.random.PRNGKey(0)
    k_x, k_w, k_b, k_x2, k_w2, k_b2 = jax.random.split(key, 6)

    pooler = jax.jit(text_pooler)   # jit so the first-token slice can fuse in

    # Small shapes implied by the module's forward.
    B, S, H = 2, 8, 32
    hidden_states = jax.random.normal(k_x, (B, S, H), dtype=jnp.float32)
    weight = jax.random.normal(k_w, (H, H), dtype=jnp.float32) * 0.02
    bias = jax.random.normal(k_b, (H,), dtype=jnp.float32) * 0.02

    out = jax.block_until_ready(pooler(hidden_states, weight, bias))
    ref = jnp.tanh(hidden_states[:, 0, :] @ weight.T + bias)
    assert out.shape == (B, H)
    assert jnp.allclose(out, ref, atol=1e-5, rtol=1e-5)

    # Second (still small) case that exercises the tiled / multi-program path.
    B2, S2, H2 = 2, 8, 256
    hs2 = jax.random.normal(k_x2, (B2, S2, H2), dtype=jnp.float32)
    w2 = jax.random.normal(k_w2, (H2, H2), dtype=jnp.float32) * 0.02
    b2 = jax.random.normal(k_b2, (H2,), dtype=jnp.float32) * 0.02

    out2 = jax.block_until_ready(pooler(hs2, w2, b2))
    ref2 = jnp.tanh(hs2[:, 0, :] @ w2.T + b2)
    assert out2.shape == (B2, H2)
    assert jnp.allclose(out2, ref2, atol=1e-5, rtol=1e-5)

    print("KERNEL_OK")
</pallas_src>

<mosaic_0001>
module attributes {stable_mosaic.version = 11 : i64} {
  func.func @_pooler_kernel(%arg0: i32, %arg1: memref<2x32xf32, #tpu.memory_space<vmem>>, %arg2: memref<32x32xf32, #tpu.memory_space<vmem>>, %arg3: memref<1x32xf32, #tpu.memory_space<vmem>>, %arg4: memref<2x32xf32, #tpu.memory_space<vmem>>) attributes {dimension_semantics = [#tpu.dimension_semantics<parallel>], iteration_bounds = array<i64: 1>, scalar_prefetch = 0 : i64, scratch_operands = 0 : i64, tpu.core_type = #tpu.core_type<tc>, window_params = [{pipeline_mode = #tpu.pipeline_mode<synchronous>, transform_indices = @transform_0, window_bounds = array<i64: 2, 32>}, {transform_indices = @transform_1, window_bounds = array<i64: 32, 32>}, {transform_indices = @transform_2, window_bounds = array<i64: 1, 32>}, {transform_indices = @transform_3, window_bounds = array<i64: 2, 32>}]} {
    %c0 = arith.constant 0 : index
    %c0_0 = arith.constant 0 : index
    %0 = vector.load %arg1[%c0, %c0_0] : memref<2x32xf32, #tpu.memory_space<vmem>>, vector<2x32xf32>
    %c0_1 = arith.constant 0 : index
    %c0_2 = arith.constant 0 : index
    %1 = vector.load %arg2[%c0_1, %c0_2] : memref<32x32xf32, #tpu.memory_space<vmem>>, vector<32x32xf32>
    %cst = arith.constant dense<0.000000e+00> : vector<2x32xf32>
    %2 = tpu.matmul %0, %1, %cst {dimension_numbers = #tpu.dot_dimension_numbers<[1], [1], [0], [0], [0, 0, 1, 0], [], []>} : vector<2x32xf32>, vector<32x32xf32>, vector<2x32xf32> -> vector<2x32xf32>
    %c0_3 = arith.constant 0 : index
    %c0_4 = arith.constant 0 : index
    %3 = vector.load %arg3[%c0_3, %c0_4] : memref<1x32xf32, #tpu.memory_space<vmem>>, vector<1x32xf32>
    %4 = vector.broadcast %3 : vector<1x32xf32> to vector<2x32xf32>
    %5 = arith.addf %2, %4 : vector<2x32xf32>
    %6 = math.tanh %5 : vector<2x32xf32>
    %c0_5 = arith.constant 0 : index
    %c0_6 = arith.constant 0 : index
    %7 = vector.load %arg4[%c0_5, %c0_6] : memref<2x32xf32, #tpu.memory_space<vmem>>, vector<2x32xf32>
    tpu.vector_store %arg4[%c0_5, %c0_6], %6 {strides = array<i32>} : memref<2x32xf32, #tpu.memory_space<vmem>>, vector<2x32xf32>,
    return
  }
  func.func @transform_0(%arg0: i32) -> (i32, i32) {
    %c0_i32 = arith.constant 0 : i32
    %c0_i32_0 = arith.constant 0 : i32
    %c0_i32_1 = arith.constant 0 : i32
    return %c0_i32, %c0_i32_0 : i32, i32
  }
  func.func @transform_1(%arg0: i32) -> (i32, i32) {
    %c0_i32 = arith.constant 0 : i32
    %c0_i32_0 = arith.constant 0 : i32
    return %arg0, %c0_i32 : i32, i32
  }
  func.func @transform_2(%arg0: i32) -> (i32, i32) {
    %c0_i32 = arith.constant 0 : i32
    %c0_i32_0 = arith.constant 0 : i32
    return %c0_i32, %arg0 : i32, i32
  }
  func.func @transform_3(%arg0: i32) -> (i32, i32) {
    %c0_i32 = arith.constant 0 : i32
    %c0_i32_0 = arith.constant 0 : i32
    return %c0_i32, %arg0 : i32, i32
  }
}

</mosaic_0001>

<bundles_post_ra>
// kernel: text_pooler.1
= control target key start
LH: loop header
LB: loop body
LE: loop exit
PB: predicated region body
PF: predicated region fallthrough
CT: control target
= control target key end

     0   :  { %8 = vsyncpa [#allocation3], 0  ;;  %s196_s0 = inlined_call_operand.vmem [shape: f32[2,32], index: 0, kind: input, shape index: {}]   ;;  %s197_s1 = inlined_call_operand.hbm [shape: f32[32,32], index: 1, kind: input, shape index: {}]   ;;  %s198_s2 = inlined_call_operand.vmem [shape: f32[1,32], index: 2, kind: input, shape index: {}]   ;;  %s199_s3 = inlined_call_operand.hbm [shape: f32[2,32], index: 3, kind: output, shape index: {}]  }
   0x1   :  { %9 = vsyncpa [#allocation4], 0  ;;  %s16_s14 = sshll.u32 %s197_s1, 4  ;;  %s160_s15 = smov [#allocation2]   ;;  %s17_s14 = int_to_ptr.hbm [resolvable:$true] %s16_s14 }
   0x2   :  { %s18_s16 = sshll.u32 %s160_s15, 4  ;;  %s161_s17 = smov 128   ;;  %s19_s16 = int_to_ptr.vmem [resolvable:$true] %s18_s16 }
   0x3   :  { %s162_s18 = smov 8  }
   0x4   :  { %24 = dma.hbm_to_vmem [thread:$0]  %s17_s14, 512, %s19_s16, [#allocation3], %s161_s17, %s161_s17, %s162_s18  }
   0x5   :  { %156 = dma.done.wait [#allocation3], 512  }
   0x6   :  { %157 = vsyncadd [#allocation3], 4294966784  ;;  %vm40_vm0 = vcmask 261120   ;;  %v35_v0 = vld [vmem:[#allocation2 + $0x18] sm:$0xff]  ;;  %v34_v1 = vld [vmem:[#allocation2 + $0x10] sm:$0xff]  ;;  %s163_s22 = smov [#allocation5]  }
   0x7   :  { %96 = vmatpush.xpose.msk.msra.mxu0 %vm40_vm0, %v35_v0  ;;  %v33_v2 = vld [vmem:[#allocation2 + $0x8] sm:$0xff]  ;;  %v32_v3 = vld [vmem:[#allocation2] sm:$0xff]  ;;  %s84_s23 = sshll.u32 %s163_s22, 4  ;;  %s86_s26 = sshll.u32 %s199_s3, 4  ;;  %vm77_vm1 = vcmask 254976   ;;  %s85_s23 = int_to_ptr.vmem [resolvable:$true] %s84_s23  ;;  %s87_s26 = int_to_ptr.hbm [resolvable:$true] %s86_s26 }
   0x8   :  { %v31_v4 = vld [vmem:[%s196_s0] sm:$0x3] }
   0x9   :  { %v105_v5 = vld [vmem:[%s198_s2] ss:$0 sm:$0xff] }
   0xb   :  { %97 = vmatpush.xpose.msk.msra.mxu0 %vm40_vm0, %v34_v1 }
   0xf   :  { %98 = vmatpush.xpose.msk.msra.mxu0 %vm40_vm0, %v33_v2 }
  0x13   :  { %99 = vmatpush.xpose.msk.msra.mxu0 %vm40_vm0, %v32_v3 }
  0x16   :  { %100 = vmatmul.msk.f32.vlgmr.msra.gmra.mxu0 %vm40_vm0, %v31_v4 }
  0x93   :  { %v73_v6 = vpop.f32.mrf.mxu0 }
  0x94   :  { %v74_v7 = vadd.f32 %v105_v5, %v73_v6 }
  0x96   :  { %106 = vtanh.f32 %v74_v7 }
  0x9c   :  { %v107_v8 = vpop.eup %106 }
  0x9d   :  { %78 = vst.msk [vmem:[#allocation5] sm:$0x3] %vm77_vm1, %v107_v8 }
  0x9e   :  { %89 = dma.vmem_to_hbm [thread:$0]  %s85_s23, 32, %s87_s26, [#allocation4]  }
  0x9f   :  { %158 = dma.done.wait [#allocation4], 32  }
  0xa0   :  { %159 = vsyncadd [#allocation4], 4294967264 }
  0xa1   :  { %94 = vsyncpa [#allocation3], 1 }
  0xa2   :  { %95 = vsyncpa [#allocation4], 1 }

</bundles_post_ra>
